<compile_context>
chip_gen: v7x
topology: tpu7x:2x2x1
jax: 0.10.0
libtpu: 0.0.40
codegen_flags: <defaults>
</compile_context>

<pallas_src>
import jax
import jax.numpy as jnp
from jax.experimental import pallas as pl
from jax.experimental.pallas import tpu as pltpu


# ----------------------------------------------------------------------------
# Fused kernel: out = relu(x @ w1 + b1) @ w2 + b2
#   x:  (tm, D_in)  f32    w1: (D_in, D_h)  bf16   b1: (1, D_h)  f32
#   w2: (D_h, D_out) bf16  b2: (1, D_out)  f32     o:  (tm, D_out) f32
# ----------------------------------------------------------------------------
def _projection_head_kernel(x_ref, w1_ref, b1_ref, w2_ref, b2_ref, o_ref):
    x_bf = x_ref[...].astype(jnp.bfloat16)

    # fc1: canonical [M,K]@[K,N] on the MXU, f32 accumulation.
    h = jnp.dot(x_bf, w1_ref[...], preferred_element_type=jnp.float32)
    h = jnp.maximum(h + b1_ref[...], 0.0)

    # fc2: same layout.
    out = jnp.dot(h.astype(jnp.bfloat16), w2_ref[...],
                  preferred_element_type=jnp.float32)
    o_ref[...] = (out + b2_ref[...]).astype(o_ref.dtype)


# ----------------------------------------------------------------------------
# One-time parameter preparation (run OUTSIDE the per-call / jitted path).
# PyTorch stores Linear weights as (out_features, in_features); we transpose
# to contraction-major and cast to bf16 exactly once.
# ----------------------------------------------------------------------------
def prepare_params(params):
    return {
        "w1": jnp.asarray(params["w1"].T, dtype=jnp.bfloat16),   # (D_in, D_h)
        "b1": jnp.asarray(params["b1"], dtype=jnp.float32).reshape(1, -1),
        "w2": jnp.asarray(params["w2"].T, dtype=jnp.bfloat16),   # (D_h, D_out)
        "b2": jnp.asarray(params["b2"], dtype=jnp.float32).reshape(1, -1),
    }


# ----------------------------------------------------------------------------
# Forward wrapper (matches PyTorch ProjectionHead.forward, eval semantics).
# Takes the *prepared* params.
# ----------------------------------------------------------------------------
def projection_head_forward(prep, x, *, flatten_first=True):
    if flatten_first:
        x = x.reshape(x.shape[0], -1)          # torch.flatten(x, 1)
    x = x.astype(jnp.float32)
    B, D_in = x.shape

    w1, b1, w2, b2 = prep["w1"], prep["b1"], prep["w2"], prep["b2"]
    D_h = w1.shape[1]
    D_out = w2.shape[1]

    # Batch tiling: fill the MXU and (on v7x) both TensorCores when B allows;
    # degenerate single tile at tiny B.  Weights stay VMEM-resident across the
    # batch grid axis (constant (0,0) index_map) so they are DMA'd once.
    if B % 256 == 0:
        tm = 256
    elif B % 128 == 0:
        tm = 128
    else:
        tm = B
    nb = B // tm

    return pl.pallas_call(
        _projection_head_kernel,
        out_shape=jax.ShapeDtypeStruct((B, D_out), jnp.float32),
        grid=(nb,),
        in_specs=[
            pl.BlockSpec((tm, D_in), lambda i: (i, 0)),
            pl.BlockSpec((D_in, D_h), lambda i: (0, 0)),    # resident weights
            pl.BlockSpec((1, D_h), lambda i: (0, 0)),
            pl.BlockSpec((D_h, D_out), lambda i: (0, 0)),   # resident weights
            pl.BlockSpec((1, D_out), lambda i: (0, 0)),
        ],
        out_specs=pl.BlockSpec((tm, D_out), lambda i: (i, 0)),
        compiler_params=pltpu.CompilerParams(
            dimension_semantics=("parallel",),
        ),
    )(x, w1, b1, w2, b2)


# ----------------------------------------------------------------------------
# Params / reference
# ----------------------------------------------------------------------------
def init_params(key, in_dim=512, out_dim=128):
    ks = jax.random.split(key, 4)
    s = 0.02
    return {
        "w1": jax.random.normal(ks[0], (in_dim, in_dim), jnp.float32) * s,
        "b1": jax.random.normal(ks[1], (in_dim,), jnp.float32) * s,
        "w2": jax.random.normal(ks[2], (out_dim, in_dim), jnp.float32) * s,
        "b2": jax.random.normal(ks[3], (out_dim,), jnp.float32) * s,
    }


def reference_forward(params, x):
    x = x.reshape(x.shape[0], -1)
    h = jnp.maximum(x @ params["w1"].T + params["b1"], 0.0)
    return h @ params["w2"].T + params["b2"]


if __name__ == "__main__":
    key = jax.random.PRNGKey(0)
    pkey, xkey = jax.random.split(key)

    in_dim, out_dim = 512, 128
    params = init_params(pkey, in_dim=in_dim, out_dim=out_dim)

    # One-time weight prep (transpose + bf16 cast) outside the per-call path.
    prep = jax.tree_util.tree_map(jax.block_until_ready, prepare_params(params))

    # 4-D input so the flatten path is exercised: (2, 2, 16, 16) -> (2, 512).
    x = jax.random.normal(xkey, (2, 2, 16, 16), jnp.float32)

    fwd = jax.jit(projection_head_forward)
    out = jax.block_until_ready(fwd(prep, x))
    assert out.shape == (2, out_dim), out.shape

    # Sanity check vs pure-JAX f32 reference (bf16 MXU operands -> loose tol).
    ref = reference_forward(params, x)
    assert bool(jnp.allclose(out, ref, rtol=5e-2, atol=1e-2)), "mismatch vs reference"

    print("KERNEL_OK")
</pallas_src>

<mosaic_0001>
module attributes {stable_mosaic.version = 11 : i64} {
  func.func @_projection_head_kernel(%arg0: i32, %arg1: memref<2x512xf32, #tpu.memory_space<vmem>>, %arg2: memref<512x512xbf16, #tpu.memory_space<vmem>>, %arg3: memref<1x512xf32, #tpu.memory_space<vmem>>, %arg4: memref<512x128xbf16, #tpu.memory_space<vmem>>, %arg5: memref<1x128xf32, #tpu.memory_space<vmem>>, %arg6: memref<2x128xf32, #tpu.memory_space<vmem>>) attributes {dimension_semantics = [#tpu.dimension_semantics<parallel>], iteration_bounds = array<i64: 1>, scalar_prefetch = 0 : i64, scratch_operands = 0 : i64, tpu.core_type = #tpu.core_type<tc>, window_params = [{transform_indices = @transform_0, window_bounds = array<i64: 2, 512>}, {pipeline_mode = #tpu.pipeline_mode<synchronous>, transform_indices = @transform_1, window_bounds = array<i64: 512, 512>}, {pipeline_mode = #tpu.pipeline_mode<synchronous>, transform_indices = @transform_2, window_bounds = array<i64: 1, 512>}, {pipeline_mode = #tpu.pipeline_mode<synchronous>, transform_indices = @transform_3, window_bounds = array<i64: 512, 128>}, {pipeline_mode = #tpu.pipeline_mode<synchronous>, transform_indices = @transform_4, window_bounds = array<i64: 1, 128>}, {transform_indices = @transform_5, window_bounds = array<i64: 2, 128>}]} {
    %c0 = arith.constant 0 : index
    %c0_0 = arith.constant 0 : index
    %0 = vector.load %arg1[%c0, %c0_0] : memref<2x512xf32, #tpu.memory_space<vmem>>, vector<2x512xf32>
    %1 = arith.truncf %0 : vector<2x512xf32> to vector<2x512xbf16>
    %c0_1 = arith.constant 0 : index
    %c0_2 = arith.constant 0 : index
    %2 = vector.load %arg2[%c0_1, %c0_2] : memref<512x512xbf16, #tpu.memory_space<vmem>>, vector<512x512xbf16>
    %cst = arith.constant dense<0.000000e+00> : vector<2x512xf32>
    %3 = tpu.matmul %1, %2, %cst {dimension_numbers = #tpu.dot_dimension_numbers<[1], [0], [0], [1], [0, 0, 1, 1], [], []>} : vector<2x512xbf16>, vector<512x512xbf16>, vector<2x512xf32> -> vector<2x512xf32>
    %c0_3 = arith.constant 0 : index
    %c0_4 = arith.constant 0 : index
    %4 = vector.load %arg3[%c0_3, %c0_4] : memref<1x512xf32, #tpu.memory_space<vmem>>, vector<1x512xf32>
    %5 = vector.broadcast %4 : vector<1x512xf32> to vector<2x512xf32>
    %6 = arith.addf %3, %5 : vector<2x512xf32>
    %cst_5 = arith.constant 0.000000e+00 : f32
    %7 = vector.broadcast %cst_5 : f32 to vector<2x512xf32>
    %8 = arith.maximumf %6, %7 : vector<2x512xf32>
    %9 = arith.truncf %8 : vector<2x512xf32> to vector<2x512xbf16>
    %c0_6 = arith.constant 0 : index
    %c0_7 = arith.constant 0 : index
    %10 = vector.load %arg4[%c0_6, %c0_7] : memref<512x128xbf16, #tpu.memory_space<vmem>>, vector<512x128xbf16>
    %cst_8 = arith.constant dense<0.000000e+00> : vector<2x128xf32>
    %11 = tpu.matmul %9, %10, %cst_8 {dimension_numbers = #tpu.dot_dimension_numbers<[1], [0], [0], [1], [0, 0, 1, 1], [], []>} : vector<2x512xbf16>, vector<512x128xbf16>, vector<2x128xf32> -> vector<2x128xf32>
    %c0_9 = arith.constant 0 : index
    %c0_10 = arith.constant 0 : index
    %12 = vector.load %arg5[%c0_9, %c0_10] : memref<1x128xf32, #tpu.memory_space<vmem>>, vector<1x128xf32>
    %13 = vector.broadcast %12 : vector<1x128xf32> to vector<2x128xf32>
    %14 = arith.addf %11, %13 : vector<2x128xf32>
    %c0_11 = arith.constant 0 : index
    %c0_12 = arith.constant 0 : index
    %15 = vector.load %arg6[%c0_11, %c0_12] : memref<2x128xf32, #tpu.memory_space<vmem>>, vector<2x128xf32>
    tpu.vector_store %arg6[%c0_11, %c0_12], %14 {strides = array<i32>} : memref<2x128xf32, #tpu.memory_space<vmem>>, vector<2x128xf32>,
    return
  }
  func.func @transform_0(%arg0: i32) -> (i32, i32) {
    %c0_i32 = arith.constant 0 : i32
    %c0_i32_0 = arith.constant 0 : i32
    return %arg0, %c0_i32 : i32, i32
  }
  func.func @transform_1(%arg0: i32) -> (i32, i32) {
    %c0_i32 = arith.constant 0 : i32
    %c0_i32_0 = arith.constant 0 : i32
    %c0_i32_1 = arith.constant 0 : i32
    return %c0_i32, %c0_i32_0 : i32, i32
  }
  func.func @transform_2(%arg0: i32) -> (i32, i32) {
    %c0_i32 = arith.constant 0 : i32
    %c0_i32_0 = arith.constant 0 : i32
    %c0_i32_1 = arith.constant 0 : i32
    return %c0_i32, %c0_i32_0 : i32, i32
  }
  func.func @transform_3(%arg0: i32) -> (i32, i32) {
    %c0_i32 = arith.constant 0 : i32
    %c0_i32_0 = arith.constant 0 : i32
    %c0_i32_1 = arith.constant 0 : i32
    return %c0_i32, %c0_i32_0 : i32, i32
  }
  func.func @transform_4(%arg0: i32) -> (i32, i32) {
    %c0_i32 = arith.constant 0 : i32
    %c0_i32_0 = arith.constant 0 : i32
    %c0_i32_1 = arith.constant 0 : i32
    return %c0_i32, %c0_i32_0 : i32, i32
  }
  func.func @transform_5(%arg0: i32) -> (i32, i32) {
    %c0_i32 = arith.constant 0 : i32
    %c0_i32_0 = arith.constant 0 : i32
    return %arg0, %c0_i32 : i32, i32
  }
}

</mosaic_0001>

<bundles_post_ra>
// kernel: projection_head_forward.1
= control target key start
LH: loop header
LB: loop body
LE: loop exit
PB: predicated region body
PF: predicated region fallthrough
CT: control target
= control target key end

     0   :  { %10 = vsyncpa [#allocation3], 0  ;;  %s2017_s0 = inlined_call_operand.vmem [shape: f32[2,512], index: 0, kind: input, shape index: {}]   ;;  %s2018_s1 = inlined_call_operand.hbm [shape: bf16[512,512], index: 1, kind: input, shape index: {}]   ;;  %s2019_s2 = inlined_call_operand.vmem [shape: f32[1,512], index: 2, kind: input, shape index: {}]   ;;  %s2020_s3 = inlined_call_operand.hbm [shape: bf16[512,128], index: 3, kind: input, shape index: {}]   ;;  %s2021_s4 = inlined_call_operand.vmem [shape: f32[1,128], index: 4, kind: input, shape index: {}]   ;;  %s2022_s5 = inlined_call_operand.hbm [shape: f32[2,128], index: 5, kind: output, shape index: {}]  }
   0x1   :  { %11 = vsyncpa [#allocation6], 0 }
   0x2   :  { %12 = vsyncpa [#allocation4], 0  ;;  %s1921_s18 = smov [#allocation2]   ;;  %s1849_s22 = scalar_lea.hbm %s2018_s1, 16384 }
   0x3   :  { %s20_s19 = sshll.u32 %s1921_s18, 4  ;;  %p1850_p0 = scmp.ne.s32.totalorder %s2018_s1, %s1849_s22  ;;  %s21_s19 = int_to_ptr.vmem [resolvable:$true] %s20_s19 }
   0x4   :  { %p1853_p1 = scmp.lt.u32.totalorder %s1849_s22, %s2018_s1 }
   0x6   :  { %p1855_p2 = pnand %p1853_p1, %p1850_p0 }
   0x8   :  { %1858 = shalt.err (!%p1855_p2)
}
   0x9   :  { %s1859_s27 = scalar_lea.vmem %s21_s19, 16384  ;;  %p1864_p4 = scmp.lt.s32.totalorder %s21_s19, %s21_s19 }
   0xa   :  { %p1860_p3 = scmp.ne.s32.totalorder %s21_s19, %s1859_s27  ;;  %p1865_p5 = scmp.lt.s32.totalorder %s1859_s27, %s1859_s27 }
   0xc   :  { %p1866_p6 = por %p1865_p5, %p1864_p4 }
   0xe   :  { %p1867_p7 = pnand %p1866_p6, %p1860_p3 }
  0x10   :  { %1870 = shalt.err (!%p1867_p7)
}
  0x11   :  { %s1922_s28 = smov 256   ;;  %s1923_s29 = smov 16  }
  0x12   :  { %26 = dma.hbm_to_vmem [thread:$0]  %s2018_s1, 16384, %s21_s19, [#allocation3], %s1922_s28, %s1922_s28, %s1923_s29  }
  0x13   :  { %s1924_s7 = smov [#allocation5]   ;;  %s1871_s11 = scalar_lea.hbm %s2020_s3, 4096 }
  0x14   :  { %s34_s8 = sshll.u32 %s1924_s7, 4  ;;  %p1872_p8 = scmp.ne.s32.totalorder %s2020_s3, %s1871_s11  ;;  %s35_s8 = int_to_ptr.vmem [resolvable:$true] %s34_s8 }
  0x15   :  { %p1875_p9 = scmp.lt.u32.totalorder %s1871_s11, %s2020_s3 }
  0x17   :  { %p1877_p10 = pnand %p1875_p9, %p1872_p8 }
  0x19   :  { %1880 = shalt.err (!%p1877_p10)
}
  0x1a   :  { %s1881_s16 = scalar_lea.vmem %s35_s8, 4096  ;;  %p1886_p12 = scmp.lt.s32.totalorder %s35_s8, %s35_s8 }
  0x1b   :  { %p1882_p11 = scmp.ne.s32.totalorder %s35_s8, %s1881_s16  ;;  %p1887_p13 = scmp.lt.s32.totalorder %s1881_s16, %s1881_s16 }
  0x1d   :  { %p1888_p0 = por %p1887_p13, %p1886_p12 }
  0x1f   :  { %p1889_p1 = pnand %p1888_p0, %p1882_p11 }
  0x21   :  { %1892 = shalt.err (!%p1889_p1)
}
  0x22   :  { %s1925_s1 = smov 64   ;;  %s1926_s17 = smov 4  }
  0x23   :  { %40 = dma.hbm_to_vmem [thread:$0]  %s2020_s3, 4096, %s35_s8, [#allocation6], %s1925_s1, %s1925_s1, %s1926_s17  }
  0x24   :  { %1915 = dma.done.wait [#allocation3], 16384  }
  0x25   :  { %1916 = vsyncadd [#allocation3], 4294950912 }
  0x26   :  { %1917 = dma.done.wait [#allocation6], 4096  }
  0x27   :  { %1918 = vsyncadd [#allocation6], 4294963200  ;;  %v1624_v0 = vld [vmem:[#allocation2 + $0x4] ss:$16 sps:$4 sm:$0xff]   ;;  %v1626_v1 = vld [vmem:[#allocation2 + $0xc] ss:$16 sps:$4 sm:$0xff]   ;;  %v56_v38 = vlaneseq }
  0x28   :  { %867 = vmatprep.subr.bf16.mxu0 %v1624_v0  ;;  %v1628_v2 = vld [vmem:[#allocation2] ss:$16 sps:$4 sm:$0xff]   ;;  %v1629_v3 = vld [vmem:[#allocation2 + $0x8] ss:$16 sps:$4 sm:$0xff]   ;;  %949 = vmatprep.subr.bf16.mxu1 %v1626_v1  ;;  %v1630_v4 = vld [vmem:[#allocation2 + $0x24] ss:$16 sps:$4 sm:$0xff]  }
  0x29   :  { %868 = vmatpush1.bf16.msra.mxu0 %v1628_v2  ;;  %950 = vmatpush1.bf16.msra.mxu1 %v1629_v3  ;;  %v1632_v5 = vld [vmem:[#allocation2 + $0x2c] ss:$16 sps:$4 sm:$0xff]   ;;  %v1634_v6 = vld [vmem:[#allocation2 + $0x20] ss:$16 sps:$4 sm:$0xff]   ;;  %v1635_v7 = vld [vmem:[#allocation2 + $0x28] ss:$16 sps:$4 sm:$0xff]  }
  0x2a   :  { %869 = vmatprep.subr.bf16.mxu0 %v1630_v4  ;;  %951 = vmatprep.subr.bf16.mxu1 %v1632_v5  ;;  %v1636_v8 = vld [vmem:[#allocation2 + $0x44] ss:$16 sps:$4 sm:$0xff]   ;;  %v1638_v9 = vld [vmem:[#allocation2 + $0x4c] ss:$16 sps:$4 sm:$0xff]   ;;  %v1640_v10 = vld [vmem:[#allocation2 + $0x40] ss:$16 sps:$4 sm:$0xff]  }
  0x2b   :  { %v1641_v11 = vld [vmem:[#allocation2 + $0x48] ss:$16 sps:$4 sm:$0xff]   ;;  %v1642_v12 = vld [vmem:[#allocation2 + $0x64] ss:$16 sps:$4 sm:$0xff]   ;;  %v1644_v13 = vld [vmem:[#allocation2 + $0x6c] ss:$16 sps:$4 sm:$0xff]  }
  0x2c   :  { %v1646_v14 = vld [vmem:[#allocation2 + $0x60] ss:$16 sps:$4 sm:$0xff]   ;;  %v1647_v15 = vld [vmem:[#allocation2 + $0x68] ss:$16 sps:$4 sm:$0xff]   ;;  %v1648_v16 = vld [vmem:[#allocation2 + $0x84] ss:$16 sps:$4 sm:$0xff]  }
  0x2d   :  { %870 = vmatpush1.bf16.msra.mxu0 %v1634_v6  ;;  %952 = vmatpush1.bf16.msra.mxu1 %v1635_v7  ;;  %v1650_v17 = vld [vmem:[#allocation2 + $0x8c] ss:$16 sps:$4 sm:$0xff]   ;;  %v1652_v18 = vld [vmem:[#allocation2 + $0x80] ss:$16 sps:$4 sm:$0xff]   ;;  %v1653_v19 = vld [vmem:[#allocation2 + $0x88] ss:$16 sps:$4 sm:$0xff]  }
  0x2e   :  { %871 = vmatprep.subr.bf16.mxu0 %v1636_v8  ;;  %953 = vmatprep.subr.bf16.mxu1 %v1638_v9  ;;  %v1654_v20 = vld [vmem:[#allocation2 + $0xa4] ss:$16 sps:$4 sm:$0xff]   ;;  %v1656_v21 = vld [vmem:[#allocation2 + $0xac] ss:$16 sps:$4 sm:$0xff]   ;;  %v1658_v22 = vld [vmem:[#allocation2 + $0xa0] ss:$16 sps:$4 sm:$0xff]  }
  0x2f   :  { %v1659_v23 = vld [vmem:[#allocation2 + $0xa8] ss:$16 sps:$4 sm:$0xff]   ;;  %v1660_v24 = vld [vmem:[#allocation2 + $0xc4] ss:$16 sps:$4 sm:$0xff]   ;;  %v1662_v25 = vld [vmem:[#allocation2 + $0xcc] ss:$16 sps:$4 sm:$0xff]  }
  0x30   :  { %v1664_v26 = vld [vmem:[#allocation2 + $0xc0] ss:$16 sps:$4 sm:$0xff]   ;;  %v1665_v27 = vld [vmem:[#allocation2 + $0xc8] ss:$16 sps:$4 sm:$0xff]   ;;  %v1666_v28 = vld [vmem:[#allocation2 + $0xe4] ss:$16 sps:$4 sm:$0xff]  }
  0x31   :  { %872 = vmatpush1.bf16.msra.mxu0 %v1640_v10  ;;  %954 = vmatpush1.bf16.msra.mxu1 %v1641_v11  ;;  %v1668_v29 = vld [vmem:[#allocation2 + $0xec] ss:$16 sps:$4 sm:$0xff]   ;;  %v1670_v30 = vld [vmem:[#allocation2 + $0xe0] ss:$16 sps:$4 sm:$0xff]   ;;  %v1671_v31 = vld [vmem:[#allocation2 + $0xe8] ss:$16 sps:$4 sm:$0xff]  }
  0x32   :  { %873 = vmatprep.subr.bf16.mxu0 %v1642_v12  ;;  %955 = vmatprep.subr.bf16.mxu1 %v1644_v13  ;;  %v1672_v32 = vld [vmem:[#allocation2 + $0x104] ss:$16 sps:$4 sm:$0xff]   ;;  %v1674_v33 = vld [vmem:[#allocation2 + $0x10c] ss:$16 sps:$4 sm:$0xff]   ;;  %v1676_v34 = vld [vmem:[#allocation2 + $0x100] ss:$16 sps:$4 sm:$0xff]  }
  0x33   :  { %v1677_v35 = vld [vmem:[#allocation2 + $0x108] ss:$16 sps:$4 sm:$0xff]   ;;  %v1927_v36 = vmov 1983009808   ;;  %v1678_v39 = vld [vmem:[#allocation2 + $0x124] ss:$16 sps:$4 sm:$0xff]  }
  0x34   :  { %v54_v37 = vunpack.c.l.s4 %v1927_v36  ;;  %v1680_v40 = vld [vmem:[#allocation2 + $0x12c] ss:$16 sps:$4 sm:$0xff]   ;;  %v1682_v41 = vld [vmem:[#allocation2 + $0x120] ss:$16 sps:$4 sm:$0xff]   ;;  %v1983_v43 = vshrl.u32 %v56_v38, 7  ;;  %s1928_s23 = smov [#allocation7]  }
  0x35   :  { %874 = vmatpush1.bf16.msra.mxu0 %v1646_v14  ;;  %956 = vmatpush1.bf16.msra.mxu1 %v1647_v15  ;;  %v1683_v44 = vld [vmem:[#allocation2 + $0x128] ss:$16 sps:$4 sm:$0xff]   ;;  %v1684_v45 = vld [vmem:[#allocation2 + $0x144] ss:$16 sps:$4 sm:$0xff]   ;;  %v1686_v46 = vld [vmem:[#allocation2 + $0x14c] ss:$16 sps:$4 sm:$0xff]  }
  0x36   :  { %875 = vmatprep.subr.bf16.mxu0 %v1648_v16  ;;  %957 = vmatprep.subr.bf16.mxu1 %v1650_v17  ;;  %v55_v42 = vunpack.c.0.s8 %v54_v37  ;;  %v1688_v47 = vld [vmem:[#allocation2 + $0x140] ss:$16 sps:$4 sm:$0xff]   ;;  %v1689_v48 = vld [vmem:[#allocation2 + $0x148] ss:$16 sps:$4 sm:$0xff]   ;;  %v1690_v50 = vld [vmem:[#allocation2 + $0x164] ss:$16 sps:$4 sm:$0xff]  }
  0x37   :  { %v1692_v51 = vld [vmem:[#allocation2 + $0x16c] ss:$16 sps:$4 sm:$0xff]   ;;  %v50_v52 = vld [vmem:[%s2017_s0] sm:$0xff]  ;;  %v1695_v55 = vld [vmem:[#allocation2 + $0x168] ss:$16 sps:$4 sm:$0xff]   ;;  %s1389_s24 = sshll.u32 %s1928_s23, 4  ;;  %s1390_s24 = int_to_ptr.vmem [resolvable:$true] %s1389_s24 }
  0x38   :  { %v58_v49 = vsub.s32 %v55_v42, %v1983_v43  ;;  %v1694_v53 = vld [vmem:[#allocation2 + $0x160] ss:$16 sps:$4 sm:$0xff]   ;;  %v1696_v56 = vld [vmem:[#allocation2 + $0x184] ss:$16 sps:$4 sm:$0xff]   ;;  %v1698_v57 = vld [vmem:[#allocation2 + $0x18c] ss:$16 sps:$4 sm:$0xff]   ;;  %v52_v4 = vcombine.high %v50_v52, %v50_v52  ;;  %p1898_p3 = scmp.lt.s32.totalorder %s1390_s24, %s1390_s24 }
  0x39   :  { %876 = vmatpush1.bf16.msra.mxu0 %v1652_v18  ;;  %958 = vmatpush1.bf16.msra.mxu1 %v1653_v19  ;;  %v1700_v59 = vld [vmem:[#allocation2 + $0x180] ss:$16 sps:$4 sm:$0xff]   ;;  %v1701_v61 = vld [vmem:[#allocation2 + $0x188] ss:$16 sps:$4 sm:$0xff]   ;;  %v1702_v62 = vld [vmem:[#allocation2 + $0x1a4] ss:$16 sps:$4 sm:$0xff]  }
  0x3a   :  { %877 = vmatprep.subr.bf16.mxu0 %v1654_v20  ;;  %959 = vmatprep.subr.bf16.mxu1 %v1656_v21  ;;  %v59_v54 = vrot.slane %v50_v52, %v58_v49  ;;  %v1704_v63 = vld [vmem:[#allocation2 + $0x1ac] ss:$16 sps:$4 sm:$0xff]   ;;  %v1706_v0 = vld [vmem:[#allocation2 + $0x1a0] ss:$16 sps:$4 sm:$0xff]   ;;  %v1707_v1 = vld [vmem:[#allocation2 + $0x1a8] ss:$16 sps:$4 sm:$0xff]   ;;  %v1989_v9 = vrot.slane %v52_v4, %v58_v49 }
  0x3b   :  { %v1708_v2 = vld [vmem:[#allocation2 + $0x1c4] ss:$16 sps:$4 sm:$0xff]   ;;  %v1710_v3 = vld [vmem:[#allocation2 + $0x1cc] ss:$16 sps:$4 sm:$0xff]   ;;  %v1712_v5 = vld [vmem:[#allocation2 + $0x1c0] ss:$16 sps:$4 sm:$0xff]  }
  0x3c   :  { %v67_v58 = vcombine.high %v59_v54, %v59_v54  ;;  %v1713_v6 = vld [vmem:[#allocation2 + $0x1c8] ss:$16 sps:$4 sm:$0xff]   ;;  %v1714_v7 = vld [vmem:[#allocation2 + $0x1e4] ss:$16 sps:$4 sm:$0xff]   ;;  %v1716_v8 = vld [vmem:[#allocation2 + $0x1ec] ss:$16 sps:$4 sm:$0xff]   ;;  %v68_v14 = vcombine.high %v1989_v9, %v1989_v9  ;;  %v73_v16 = vpack.c.bf16 %v59_v54, %v59_v54 }
  0x3d   :  { %878 = vmatpush1.bf16.msra.mxu0 %v1658_v22  ;;  %960 = vmatpush1.bf16.msra.mxu1 %v1659_v23  ;;  %v1718_v10 = vld [vmem:[#allocation2 + $0x1e0] ss:$16 sps:$4 sm:$0xff]   ;;  %v1719_v11 = vld [vmem:[#allocation2 + $0x1e8] ss:$16 sps:$4 sm:$0xff]   ;;  %v1723_v12 = vld [vmem:[#allocation2 + $0x204] ss:$16 sps:$4 sm:$0xff]  }
  0x3e   :  { %879 = vmatprep.subr.bf16.mxu0 %v1660_v24  ;;  %961 = vmatprep.subr.bf16.mxu1 %v1662_v25  ;;  %v74_v60 = vpack.c.bf16 %v67_v58, %v67_v58  ;;  %v1726_v13 = vld [vmem:[#allocation2 + $0x20c] ss:$16 sps:$4 sm:$0xff]   ;;  %v1721_v15 = vld [vmem:[#allocation2 + $0x200] ss:$16 sps:$4 sm:$0xff]   ;;  %v1724_v17 = vld [vmem:[#allocation2 + $0x208] ss:$16 sps:$4 sm:$0xff]   ;;  %v76_v20 = vpack.c.bf16 %v68_v14, %v68_v14 }
  0x3f   :  { %v1729_v18 = vld [vmem:[#allocation2 + $0x224] ss:$16 sps:$4 sm:$0xff]   ;;  %v1732_v19 = vld [vmem:[#allocation2 + $0x22c] ss:$16 sps:$4 sm:$0xff]   ;;  %v1727_v21 = vld [vmem:[#allocation2 + $0x220] ss:$16 sps:$4 sm:$0xff]  }
  0x40   :  { %899 = vmatprep.mubr.bf16.mxu0 %v74_v60  ;;  %981 = vmatprep.mubr.bf16.mxu1 %v74_v60  ;;  %v1730_v22 = vld [vmem:[#allocation2 + $0x228] ss:$16 sps:$4 sm:$0xff]   ;;  %v1735_v23 = vld [vmem:[#allocation2 + $0x244] ss:$16 sps:$4 sm:$0xff]   ;;  %v1738_v24 = vld [vmem:[#allocation2 + $0x24c] ss:$16 sps:$4 sm:$0xff]  }
  0x41   :  { %880 = vmatpush1.bf16.msra.mxu0 %v1664_v26  ;;  %962 = vmatpush1.bf16.msra.mxu1 %v1665_v27  ;;  %v1733_v25 = vld [vmem:[#allocation2 + $0x240] ss:$16 sps:$4 sm:$0xff]   ;;  %v1736_v26 = vld [vmem:[#allocation2 + $0x248] ss:$16 sps:$4 sm:$0xff]   ;;  %v1741_v27 = vld [vmem:[#allocation2 + $0x264] ss:$16 sps:$4 sm:$0xff]  }
  0x42   :  { %881 = vmatprep.subr.bf16.mxu0 %v1666_v28  ;;  %963 = vmatprep.subr.bf16.mxu1 %v1668_v29  ;;  %v1744_v28 = vld [vmem:[#allocation2 + $0x26c] ss:$16 sps:$4 sm:$0xff]   ;;  %v1739_v29 = vld [vmem:[#allocation2 + $0x260] ss:$16 sps:$4 sm:$0xff]   ;;  %v1754_v38 = vld [vmem:[#allocation2 + $0x2a8] ss:$16 sps:$4 sm:$0xff]  }
  0x43   :  { %v1756_v36 = vld [vmem:[#allocation2 + $0x2ac] ss:$16 sps:$4 sm:$0xff]   ;;  %v1751_v37 = vld [vmem:[#allocation2 + $0x2a0] ss:$16 sps:$4 sm:$0xff]   ;;  %v1760_v42 = vld [vmem:[#allocation2 + $0x2c8] ss:$16 sps:$4 sm:$0xff]  }
  0x44   :  { %v1774_v49 = vld [vmem:[#allocation2 + $0x30c] ss:$16 sps:$4 sm:$0xff]   ;;  %v1777_v52 = vld [vmem:[#allocation2 + $0x324] ss:$16 sps:$4 sm:$0xff]   ;;  %v1775_v54 = vld [vmem:[#allocation2 + $0x320] ss:$16 sps:$4 sm:$0xff]  }
  0x45   :  { %882 = vmatpush1.bf16.msra.mxu0 %v1670_v30  ;;  %964 = vmatpush1.bf16.msra.mxu1 %v1671_v31  ;;  %v1742_v30 = vld [vmem:[#allocation2 + $0x268] ss:$16 sps:$4 sm:$0xff]   ;;  %v1747_v31 = vld [vmem:[#allocation2 + $0x284] ss:$16 sps:$4 sm:$0xff]   ;;  %v1781_v58 = vld [vmem:[#allocation2 + $0x340] ss:$16 sps:$4 sm:$0xff]  }
  0x46   :  { %883 = vmatprep.subr.bf16.mxu0 %v1672_v32  ;;  %965 = vmatprep.subr.bf16.mxu1 %v1674_v33  ;;  %v1750_v32 = vld [vmem:[#allocation2 + $0x28c] ss:$16 sps:$4 sm:$0xff]   ;;  %v1745_v33 = vld [vmem:[#allocation2 + $0x280] ss:$16 sps:$4 sm:$0xff]   ;;  %v1789_v60 = vld [vmem:[#allocation2 + $0x364] ss:$16 sps:$4 sm:$0xff]  }
  0x47   :  { %v1801_v4 = vld [vmem:[#allocation2 + $0x3a4] ss:$16 sps:$4 sm:$0xff]   ;;  %v1816_v14 = vld [vmem:[#allocation2 + $0x3ec] ss:$16 sps:$4 sm:$0xff]   ;;  %s1893_s25 = scalar_lea.vmem %s1390_s24, 32 }
  0x48   :  { %p1894_p2 = scmp.ne.s32.totalorder %s1390_s24, %s1893_s25  ;;  %p1899_p4 = scmp.lt.s32.totalorder %s1893_s25, %s1893_s25 }
  0x49   :  { %884 = vmatpush1.bf16.msra.mxu0 %v1676_v34  ;;  %966 = vmatpush1.bf16.msra.mxu1 %v1677_v35  ;;  %v1748_v34 = vld [vmem:[#allocation2 + $0x288] ss:$16 sps:$4 sm:$0xff]   ;;  %v1753_v35 = vld [vmem:[#allocation2 + $0x2a4] ss:$16 sps:$4 sm:$0xff]  }
  0x4a   :  { %885 = vmatprep.subr.bf16.mxu0 %v1678_v39  ;;  %967 = vmatprep.subr.bf16.mxu1 %v1680_v40  ;;  %v1759_v39 = vld [vmem:[#allocation2 + $0x2c4] ss:$16 sps:$4 sm:$0xff]   ;;  %v1762_v40 = vld [vmem:[#allocation2 + $0x2cc] ss:$16 sps:$4 sm:$0xff]   ;;  %p1900_p5 = por %p1899_p4, %p1898_p3 }
  0x4c   :  { %p1901_p6 = pnand %p1900_p5, %p1894_p2 }
  0x4d   :  { %886 = vmatpush1.bf16.msra.mxu0 %v1682_v41  ;;  %968 = vmatpush1.bf16.msra.mxu1 %v1683_v44  ;;  %v1757_v41 = vld [vmem:[#allocation2 + $0x2c0] ss:$16 sps:$4 sm:$0xff]   ;;  %v1765_v44 = vld [vmem:[#allocation2 + $0x2e4] ss:$16 sps:$4 sm:$0xff]  }
  0x4e   :  { %887 = vmatprep.subr.bf16.mxu0 %v1684_v45  ;;  %969 = vmatprep.subr.bf16.mxu1 %v1686_v46  ;;  %v1768_v45 = vld [vmem:[#allocation2 + $0x2ec] ss:$16 sps:$4 sm:$0xff]   ;;  %v1763_v46 = vld [vmem:[#allocation2 + $0x2e0] ss:$16 sps:$4 sm:$0xff]  }
  0x51   :  { %888 = vmatpush1.bf16.msra.mxu0 %v1688_v47  ;;  %970 = vmatpush1.bf16.msra.mxu1 %v1689_v48  ;;  %v1766_v47 = vld [vmem:[#allocation2 + $0x2e8] ss:$16 sps:$4 sm:$0xff]   ;;  %v1771_v48 = vld [vmem:[#allocation2 + $0x304] ss:$16 sps:$4 sm:$0xff]  }
  0x52   :  { %889 = vmatprep.subr.bf16.mxu0 %v1690_v50  ;;  %971 = vmatprep.subr.bf16.mxu1 %v1692_v51  ;;  %v1769_v50 = vld [vmem:[#allocation2 + $0x300] ss:$16 sps:$4 sm:$0xff]   ;;  %v1772_v51 = vld [vmem:[#allocation2 + $0x308] ss:$16 sps:$4 sm:$0xff]  }
  0x55   :  { %890 = vmatpush1.bf16.msra.mxu0 %v1694_v53  ;;  %972 = vmatpush1.bf16.msra.mxu1 %v1695_v55  ;;  %v1780_v53 = vld [vmem:[#allocation2 + $0x32c] ss:$16 sps:$4 sm:$0xff]   ;;  %v1778_v55 = vld [vmem:[#allocation2 + $0x328] ss:$16 sps:$4 sm:$0xff]  }
  0x56   :  { %891 = vmatprep.subr.bf16.mxu0 %v1696_v56  ;;  %973 = vmatprep.subr.bf16.mxu1 %v1698_v57  ;;  %v1783_v56 = vld [vmem:[#allocation2 + $0x344] ss:$16 sps:$4 sm:$0xff]   ;;  %v1786_v57 = vld [vmem:[#allocation2 + $0x34c] ss:$16 sps:$4 sm:$0xff]  }
  0x59   :  { %892 = vmatpush1.bf16.msra.mxu0 %v1700_v59  ;;  %974 = vmatpush1.bf16.msra.mxu1 %v1701_v61  ;;  %v1784_v59 = vld [vmem:[#allocation2 + $0x348] ss:$16 sps:$4 sm:$0xff]   ;;  %v1792_v61 = vld [vmem:[#allocation2 + $0x36c] ss:$16 sps:$4 sm:$0xff]  }
  0x5a   :  { %893 = vmatprep.subr.bf16.mxu0 %v1702_v62  ;;  %975 = vmatprep.subr.bf16.mxu1 %v1704_v63  ;;  %v1787_v62 = vld [vmem:[#allocation2 + $0x360] ss:$16 sps:$4 sm:$0xff]   ;;  %v1790_v63 = vld [vmem:[#allocation2 + $0x368] ss:$16 sps:$4 sm:$0xff]  }
  0x5d   :  { %894 = vmatpush1.bf16.msra.mxu0 %v1706_v0  ;;  %976 = vmatpush1.bf16.msra.mxu1 %v1707_v1  ;;  %v1795_v0 = vld [vmem:[#allocation2 + $0x384] ss:$16 sps:$4 sm:$0xff]   ;;  %v1798_v1 = vld [vmem:[#allocation2 + $0x38c] ss:$16 sps:$4 sm:$0xff]  }
  0x5e   :  { %895 = vmatprep.subr.bf16.mxu0 %v1708_v2  ;;  %977 = vmatprep.subr.bf16.mxu1 %v1710_v3  ;;  %v1793_v2 = vld [vmem:[#allocation2 + $0x380] ss:$16 sps:$4 sm:$0xff]   ;;  %v1796_v3 = vld [vmem:[#allocation2 + $0x388] ss:$16 sps:$4 sm:$0xff]  }
  0x61   :  { %896 = vmatpush1.bf16.msra.mxu0 %v1712_v5  ;;  %978 = vmatpush1.bf16.msra.mxu1 %v1713_v6  ;;  %v1804_v5 = vld [vmem:[#allocation2 + $0x3ac] ss:$16 sps:$4 sm:$0xff]   ;;  %v1799_v6 = vld [vmem:[#allocation2 + $0x3a0] ss:$16 sps:$4 sm:$0xff]  }
  0x62   :  { %897 = vmatprep.subr.bf16.mxu0 %v1714_v7  ;;  %979 = vmatprep.subr.bf16.mxu1 %v1716_v8  ;;  %v1802_v7 = vld [vmem:[#allocation2 + $0x3a8] ss:$16 sps:$4 sm:$0xff]   ;;  %v1807_v8 = vld [vmem:[#allocation2 + $0x3c4] ss:$16 sps:$4 sm:$0xff]  }
  0x65   :  { %898 = vmatpush1.bf16.msra.mxu0 %v1718_v10  ;;  %980 = vmatpush1.bf16.msra.mxu1 %v1719_v11  ;;  %v1810_v10 = vld [vmem:[#allocation2 + $0x3cc] ss:$16 sps:$4 sm:$0xff]   ;;  %v1805_v11 = vld [vmem:[#allocation2 + $0x3c0] ss:$16 sps:$4 sm:$0xff]  }
  0x66   :  { %908 = vmatprep.subr.bf16.mxu0 %v1723_v12  ;;  %990 = vmatprep.subr.bf16.mxu1 %v1726_v13  ;;  %v1808_v12 = vld [vmem:[#allocation2 + $0x3c8] ss:$16 sps:$4 sm:$0xff]   ;;  %v1813_v13 = vld [vmem:[#allocation2 + $0x3e4] ss:$16 sps:$4 sm:$0xff]  }
  0x68   :  { %900 = vmatmul.mubr.bf16.vlgmr.msra.gmra.mrb[0].mxu0 %v73_v16  ;;  %982 = vmatmul.mubr.bf16.vlgmr.msra.gmra.mrb[0].mxu1 %v73_v16  ;;  %v1814_v16 = vld [vmem:[#allocation2 + $0x3e8] ss:$16 sps:$4 sm:$0xff]  }
  0x69   :  { %909 = vmatpush1.bf16.msra.mxu0 %v1721_v15  ;;  %991 = vmatpush1.bf16.msra.mxu1 %v1724_v17  ;;  %v1811_v15 = vld [vmem:[#allocation2 + $0x3e0] ss:$16 sps:$4 sm:$0xff]  }
  0x6a   :  { %910 = vmatprep.subr.bf16.mxu0 %v1729_v18  ;;  %992 = vmatprep.subr.bf16.mxu1 %v1732_v19  ;;  %v1817_v17 = vld [vmem:[#allocation5 + $0x40] sm:$0xff]   ;;  %v75_v19 = vpack.c.bf16 %v1989_v9, %v1989_v9  ;;  %v1827_v9 = vld [vmem:[#allocation5 + $0x10] sm:$0xff]  }
  0x6b   :  { %940 = vmatprep.mubr.bf16.mxu0 %v76_v20  ;;  %1022 = vmatprep.mubr.bf16.mxu1 %v76_v20  ;;  %v1818_v18 = vld [vmem:[#allocation5 + $0xc0] sm:$0xff]  }
  0x6c   :  { %v1819_v20 = vld [vmem:[#allocation5] sm:$0xff]  }
  0x6d   :  { %911 = vmatpush1.bf16.msra.mxu0 %v1727_v21  ;;  %993 = vmatpush1.bf16.msra.mxu1 %v1730_v22  ;;  %v1820_v21 = vld [vmem:[#allocation5 + $0x80] sm:$0xff]   ;;  %v1821_v22 = vld [vmem:[#allocation5 + $0x48] sm:$0xff]  }
  0x6e   :  { %912 = vmatprep.subr.bf16.mxu0 %v1735_v23  ;;  %994 = vmatprep.subr.bf16.mxu1 %v1738_v24  ;;  %v1822_v23 = vld [vmem:[#allocation5 + $0xc8] sm:$0xff]  }
  0x6f   :  { %v1823_v24 = vld [vmem:[#allocation5 + $0x8] sm:$0xff]  }
  0x71   :  { %913 = vmatpush1.bf16.msra.mxu0 %v1733_v25  ;;  %995 = vmatpush1.bf16.msra.mxu1 %v1736_v26  ;;  %v1824_v25 = vld [vmem:[#allocation5 + $0x88] sm:$0xff]   ;;  %v1825_v26 = vld [vmem:[#allocation5 + $0x50] sm:$0xff]  }
  0x72   :  { %914 = vmatprep.subr.bf16.mxu0 %v1741_v27  ;;  %996 = vmatprep.subr.bf16.mxu1 %v1744_v28  ;;  %v1826_v27 = vld [vmem:[#allocation5 + $0xd0] sm:$0xff]  }
  0x73   :  { %v1828_v28 = vld [vmem:[#allocation5 + $0x90] sm:$0xff]  }
  0x75   :  { %915 = vmatpush1.bf16.msra.mxu0 %v1739_v29  ;;  %997 = vmatpush1.bf16.msra.mxu1 %v1742_v30  ;;  %v1829_v29 = vld [vmem:[#allocation5 + $0x58] sm:$0xff]  }
  0x76   :  { %916 = vmatprep.subr.bf16.mxu0 %v1747_v31  ;;  %998 = vmatprep.subr.bf16.mxu1 %v1750_v32  ;;  %v1830_v30 = vld [vmem:[#allocation5 + $0xd8] sm:$0xff]  }
  0x77   :  { %v1831_v31 = vld [vmem:[#allocation5 + $0x18] sm:$0xff]  }
  0x78   :  { %v1832_v32 = vld [vmem:[#allocation5 + $0x98] sm:$0xff]  }
  0x79   :  { %917 = vmatpush1.bf16.msra.mxu0 %v1745_v33  ;;  %999 = vmatpush1.bf16.msra.mxu1 %v1748_v34  ;;  %v1833_v33 = vld [vmem:[#allocation5 + $0x60] sm:$0xff]  }
  0x7a   :  { %918 = vmatprep.subr.bf16.mxu0 %v1753_v35  ;;  %1000 = vmatprep.subr.bf16.mxu1 %v1756_v36  ;;  %v1834_v34 = vld [vmem:[#allocation5 + $0xe0] sm:$0xff]  }
  0x7b   :  { %v1835_v35 = vld [vmem:[#allocation5 + $0x20] sm:$0xff]  }
  0x7c   :  { %v1836_v36 = vld [vmem:[#allocation5 + $0xa0] sm:$0xff]  }
  0x7d   :  { %919 = vmatpush1.bf16.msra.mxu0 %v1751_v37  ;;  %1001 = vmatpush1.bf16.msra.mxu1 %v1754_v38  ;;  %v1837_v37 = vld [vmem:[#allocation5 + $0x68] sm:$0xff]  }
  0x7e   :  { %920 = vmatprep.subr.bf16.mxu0 %v1759_v39  ;;  %1002 = vmatprep.subr.bf16.mxu1 %v1762_v40  ;;  %v1838_v38 = vld [vmem:[#allocation5 + $0xe8] sm:$0xff]  }
  0x7f   :  { %v1839_v39 = vld [vmem:[#allocation5 + $0x28] sm:$0xff]  }
  0x80   :  { %v1840_v40 = vld [vmem:[#allocation5 + $0xa8] sm:$0xff]  }
  0x81   :  { %921 = vmatpush1.bf16.msra.mxu0 %v1757_v41  ;;  %1003 = vmatpush1.bf16.msra.mxu1 %v1760_v42  ;;  %v1841_v41 = vld [vmem:[#allocation5 + $0x70] sm:$0xff]  }
  0x82   :  { %922 = vmatprep.subr.bf16.mxu0 %v1765_v44  ;;  %1004 = vmatprep.subr.bf16.mxu1 %v1768_v45  ;;  %v1842_v42 = vld [vmem:[#allocation5 + $0xf0] sm:$0xff]  }
  0x83   :  { %v1843_v44 = vld [vmem:[#allocation5 + $0x30] sm:$0xff]  }
  0x84   :  { %v1844_v45 = vld [vmem:[#allocation5 + $0xb0] sm:$0xff]  }
  0x85   :  { %923 = vmatpush1.bf16.msra.mxu0 %v1763_v46  ;;  %1005 = vmatpush1.bf16.msra.mxu1 %v1766_v47  ;;  %v1845_v46 = vld [vmem:[#allocation5 + $0x78] sm:$0xff]  }
  0x86   :  { %924 = vmatprep.subr.bf16.mxu0 %v1771_v48  ;;  %1006 = vmatprep.subr.bf16.mxu1 %v1774_v49  ;;  %v1846_v47 = vld [vmem:[#allocation5 + $0xf8] sm:$0xff]  }
  0x87   :  { %v1847_v48 = vld [vmem:[#allocation5 + $0x38] sm:$0xff]  }
  0x88   :  { %v1848_v49 = vld [vmem:[#allocation5 + $0xb8] sm:$0xff]  }
  0x89   :  { %925 = vmatpush1.bf16.msra.mxu0 %v1769_v50  ;;  %1007 = vmatpush1.bf16.msra.mxu1 %v1772_v51  ;;  %v209_v50 = vsub.s32 0, %v1983_v43  ;;  %v217_v51 = vsub.s32 2, %v1983_v43 }
  0x8a   :  { %926 = vmatprep.subr.bf16.mxu0 %v1777_v52  ;;  %1008 = vmatprep.subr.bf16.mxu1 %v1780_v53  ;;  %v205_v52 = vld [vmem:[%s2019_s2] sm:$0xf]  ;;  %v213_v53 = vsub.s32 1, %v1983_v43 }
  0x8d   :  { %927 = vmatpush1.bf16.msra.mxu0 %v1775_v54  ;;  %1009 = vmatpush1.bf16.msra.mxu1 %v1778_v55  ;;  %v221_v54 = vsub.s32 3, %v1983_v43  ;;  %v210_v55 = vrot.slane %v205_v52, %v209_v50 }
  0x8e   :  { %928 = vmatprep.subr.bf16.mxu0 %v1783_v56  ;;  %1010 = vmatprep.subr.bf16.mxu1 %v1786_v57  ;;  %v218_v56 = vrot.slane %v205_v52, %v217_v51  ;;  %v214_v57 = vrot.slane %v205_v52, %v213_v53 }
  0x91   :  { %929 = vmatpush1.bf16.msra.mxu0 %v1781_v58  ;;  %1011 = vmatpush1.bf16.msra.mxu1 %v1784_v59  ;;  %v222_v58 = vrot.slane %v205_v52, %v221_v54 }
  0x92   :  { %930 = vmatprep.subr.bf16.mxu0 %v1789_v60  ;;  %1012 = vmatprep.subr.bf16.mxu1 %v1792_v61 }
  0x95   :  { %931 = vmatpush1.bf16.msra.mxu0 %v1787_v62  ;;  %1013 = vmatpush1.bf16.msra.mxu1 %v1790_v63 }
  0x96   :  { %932 = vmatprep.subr.bf16.mxu0 %v1795_v0  ;;  %1014 = vmatprep.subr.bf16.mxu1 %v1798_v1 }
  0x99   :  { %933 = vmatpush1.bf16.msra.mxu0 %v1793_v2  ;;  %1015 = vmatpush1.bf16.msra.mxu1 %v1796_v3 }
  0x9a   :  { %934 = vmatprep.subr.bf16.mxu0 %v1801_v4  ;;  %1016 = vmatprep.subr.bf16.mxu1 %v1804_v5 }
  0x9d   :  { %935 = vmatpush1.bf16.msra.mxu0 %v1799_v6  ;;  %1017 = vmatpush1.bf16.msra.mxu1 %v1802_v7 }
  0x9e   :  { %936 = vmatprep.subr.bf16.mxu0 %v1807_v8  ;;  %1018 = vmatprep.subr.bf16.mxu1 %v1810_v10 }
  0xa1   :  { %937 = vmatpush1.bf16.msra.mxu0 %v1805_v11  ;;  %1019 = vmatpush1.bf16.msra.mxu1 %v1808_v12 }
  0xa2   :  { %938 = vmatprep.subr.bf16.mxu0 %v1813_v13  ;;  %1020 = vmatprep.subr.bf16.mxu1 %v1816_v14 }
  0xa5   :  { %939 = vmatpush1.bf16.msra.mxu0 %v1811_v15  ;;  %1021 = vmatpush1.bf16.msra.mxu1 %v1814_v16 }
  0xa6   :  { %1560 = vmatprep.subr.bf16.mxu0 %v1817_v17  ;;  %1582 = vmatprep.subr.bf16.mxu1 %v1818_v18  ;;  %v1527_v17 = vld [vmem:[%s2021_s4] ss:$0 sm:$0xff] }
  0xa8   :  { %941 = vmatmul.mubr.bf16.vlgmr.msra.gmra.mrb[0].mxu0 %v75_v19  ;;  %1023 = vmatmul.mubr.bf16.vlgmr.msra.gmra.mrb[0].mxu1 %v75_v19 }
  0xa9   :  { %1561 = vmatpush3.bf16.msra.mxu0 %v1819_v20  ;;  %1583 = vmatpush3.bf16.msra.mxu1 %v1820_v21 }
  0xaa   :  { %1562 = vmatprep.subr.bf16.mxu0 %v1821_v22  ;;  %1584 = vmatprep.subr.bf16.mxu1 %v1822_v23 }
  0xad   :  { %1563 = vmatpush3.bf16.msra.mxu0 %v1823_v24  ;;  %1585 = vmatpush3.bf16.msra.mxu1 %v1824_v25 }
  0xae   :  { %1564 = vmatprep.subr.bf16.mxu0 %v1825_v26  ;;  %1586 = vmatprep.subr.bf16.mxu1 %v1826_v27 }
  0xb1   :  { %1565 = vmatpush3.bf16.msra.mxu0 %v1827_v9  ;;  %1587 = vmatpush3.bf16.msra.mxu1 %v1828_v28 }
  0xb2   :  { %1566 = vmatprep.subr.bf16.mxu0 %v1829_v29  ;;  %1588 = vmatprep.subr.bf16.mxu1 %v1830_v30 }
  0xb5   :  { %1567 = vmatpush3.bf16.msra.mxu0 %v1831_v31  ;;  %1589 = vmatpush3.bf16.msra.mxu1 %v1832_v32 }
  0xb6   :  { %1568 = vmatprep.subr.bf16.mxu0 %v1833_v33  ;;  %1590 = vmatprep.subr.bf16.mxu1 %v1834_v34 }
  0xb9   :  { %1569 = vmatpush3.bf16.msra.mxu0 %v1835_v35  ;;  %1591 = vmatpush3.bf16.msra.mxu1 %v1836_v36 }
  0xba   :  { %1570 = vmatprep.subr.bf16.mxu0 %v1837_v37  ;;  %1592 = vmatprep.subr.bf16.mxu1 %v1838_v38 }
  0xbd   :  { %1571 = vmatpush3.bf16.msra.mxu0 %v1839_v39  ;;  %1593 = vmatpush3.bf16.msra.mxu1 %v1840_v40 }
  0xbe   :  { %1572 = vmatprep.subr.bf16.mxu0 %v1841_v41  ;;  %1594 = vmatprep.subr.bf16.mxu1 %v1842_v42 }
  0xc1   :  { %1573 = vmatpush3.bf16.msra.mxu0 %v1843_v44  ;;  %1595 = vmatpush3.bf16.msra.mxu1 %v1844_v45 }
  0xc2   :  { %1574 = vmatprep.subr.bf16.mxu0 %v1845_v46  ;;  %1596 = vmatprep.subr.bf16.mxu1 %v1846_v47 }
  0xc5   :  { %1575 = vmatpush3.bf16.msra.mxu0 %v1847_v48  ;;  %1597 = vmatpush3.bf16.msra.mxu1 %v1848_v49 }
 0x17b   :  { %v942_v59 = vpop.f32.mrb[0].mxu0  ;;  %v1024_v60 = vpop.f32.mrb[0].mxu1 }
 0x17c   :  { %v1604_v61 = vadd.f32 %v942_v59, %v210_v55  ;;  %v1606_v62 = vadd.f32 %v1024_v60, %v218_v56  ;;  %v944_v63 = vpop.f32.mrb[1].mxu0  ;;  %v1026_v0 = vpop.f32.mrb[1].mxu1 }
 0x17d   :  { %v1605_v1 = vadd.f32 %v944_v63, %v214_v57  ;;  %v1607_v2 = vadd.f32 %v1026_v0, %v222_v58  ;;  %v946_v3 = vpop.f32.mrb[2].mxu0  ;;  %v1028_v4 = vpop.f32.mrb[2].mxu1 }
 0x17e   :  { %v1031_v5 = vmax.f32 %v1604_v61, 0.0  ;;  %v1033_v6 = vmax.f32 %v1606_v62, 0.0  ;;  %v947_v7 = vpop.f32.mrb[3].mxu0  ;;  %v1029_v8 = vpop.f32.mrb[3].mxu1 }
 0x17f   :  { %v1032_v10 = vmax.f32 %v1605_v1, 0.0  ;;  %v1034_v43 = vmax.f32 %v1607_v2, 0.0 }
 0x180   :  { %v1035_v13 = vpack.c.bf16 %v1031_v5, %v1031_v5  ;;  %v1037_v14 = vpack.c.bf16 %v1033_v6, %v1033_v6 }
 0x181   :  { %v1036_v11 = vpack.c.bf16 %v1032_v10, %v1032_v10  ;;  %v1038_v12 = vpack.c.bf16 %v1034_v43, %v1034_v43 }
 0x183   :  { %1334 = vmatprep.mubr.bf16.mxu0 %v1036_v11  ;;  %1374 = vmatprep.mubr.bf16.mxu1 %v1038_v12 }
 0x184   :  { %1335 = vmatmul.mubr.bf16.vlgmr.msra.gmra.mrb[4].mxu0 %v1035_v13  ;;  %1375 = vmatmul.mubr.bf16.vlgmr.msra.gmra.mrb[4].mxu1 %v1037_v14 }
 0x257   :  { %v1576_v15 = vpop.f32.mrb[4].mxu0  ;;  %v1598_v16 = vpop.f32.mrb[4].mxu1 }
 0x258   :  { %v1577_v18 = vpop.f32.mrb[5].mxu0  ;;  %v1599_v19 = vpop.f32.mrb[5].mxu1 }
 0x259   :  { %v1578_v20 = vadd.f32 %v1577_v18, %v1576_v15  ;;  %v1600_v21 = vadd.f32 %v1599_v19, %v1598_v16  ;;  %v1579_v22 = vpop.f32.mrb[6].mxu0  ;;  %v1601_v23 = vpop.f32.mrb[6].mxu1 }
 0x25a   :  { %v1580_v24 = vpop.f32.mrb[7].mxu0  ;;  %v1602_v25 = vpop.f32.mrb[7].mxu1 }
 0x25b   :  { %v1337_v26 = vadd.f32 %v1578_v20, %v1527_v17 }
 0x25d   :  { %v1377_v27 = vadd.f32 %v1600_v21, %v1337_v26 }
 0x25f   :  { %1382 = vst [vmem:[#allocation7] sm:$0x3] %v1377_v27 }
 0x260   :  { %1904 = shalt.err (!%p1901_p6)
}
 0x261   :  { %s1905_s27 = scalar_lea.hbm %s2022_s5, 32 }
 0x262   :  { %p1906_p7 = scmp.ne.s32.totalorder %s2022_s5, %s1905_s27  ;;  %p1909_p8 = scmp.lt.u32.totalorder %s1905_s27, %s2022_s5 }
 0x264   :  { %p1911_p9 = pnand %p1909_p8, %p1906_p7 }
 0x266   :  { %1914 = shalt.err (!%p1911_p9)
}
 0x267   :  { %1392 = dma.vmem_to_hbm [thread:$0]  %s1390_s24, 32, %s2022_s5, [#allocation4]  }
 0x268   :  { %1919 = dma.done.wait [#allocation4], 32  }
 0x269   :  { %1920 = vsyncadd [#allocation4], 4294967264 }
 0x26a   :  { %1396 = vsyncpa [#allocation3], 1 }
 0x26b   :  { %1397 = vsyncpa [#allocation6], 1 }
 0x26c   :  { %1398 = vsyncpa [#allocation4], 1 }

</bundles_post_ra>
